<compile_context>
chip_gen: v7x
topology: tpu7x:2x2x1
jax: 0.10.0
libtpu: 0.0.40
codegen_flags: <defaults>
</compile_context>

<pallas_src>
import math

import jax
import jax.numpy as jnp
from jax.experimental import pallas as pl
from jax.experimental.pallas import tpu as pltpu


def _make_pe_table(max_len: int, d: int) -> jnp.ndarray:
    """Deterministic sinusoidal table, identical to the PyTorch __init__."""
    pos = jnp.arange(max_len, dtype=jnp.float32)[:, None]            # (ml, 1)
    div = jnp.exp(jnp.arange(0, d, 2, dtype=jnp.float32)
                  * (-math.log(10000.0) / d))                        # (d/2,)
    angles = pos * div                                               # (ml, d/2)
    pe = jnp.zeros((max_len, d), dtype=jnp.float32)
    pe = pe.at[:, 0::2].set(jnp.sin(angles))
    pe = pe.at[:, 1::2].set(jnp.cos(angles))
    return pe                                                        # (ml, d)


def _posenc_kernel(x_ref, pe_ref, o_ref):
    # x_ref: (b_blk, T*D) lane-dense batch block; pe_ref: (1, T*D) resident
    # table (constant index_map -> pinned in VMEM).  Row-broadcast VPU add.
    o_ref[...] = x_ref[...] + pe_ref[...]


def _block_cap_bytes() -> int:
    """Per-block byte cap for x, safe under each generation's default scoped VMEM."""
    cap = 2 * 1024 * 1024               # v5e: 3 in + 2 out bufs = 10 MiB of 16 MiB
    try:
        kind = jax.devices()[0].device_kind.lower()
        if ("v6" in kind) or ("v7" in kind):
            cap = 4 * 1024 * 1024       # v6e/v7x: 3 in + 2 out = 20 MiB of 32 MiB
    except Exception:
        pass
    return cap


def _choose_batch_block(B: int, row_bytes: int, cap_bytes: int) -> int:
    """Pick a sublane-aligned batch block that yields >= 4 (even) pipelined steps."""
    total = B * row_bytes
    if total <= 256 * 1024 or B < 8:
        # Too small for pipelining to pay for the ~0.35 us/step overhead.
        return B
    cap_rows = max(8, ((cap_bytes // row_bytes) // 8) * 8)
    # At least 4 blocks so read/write DMAs overlap; even count balances the
    # two v7x TensorCores when the grid axis is sharded "parallel".
    target_blocks = max(4, -(-total // cap_bytes))
    if target_blocks % 2:
        target_blocks += 1
    b_blk = -(-B // target_blocks)
    b_blk = ((b_blk + 7) // 8) * 8          # sublane-aligned
    b_blk = max(8, min(b_blk, cap_rows))
    return b_blk


def pos_enc(x: jnp.ndarray, pe_full: jnp.ndarray, *,
            min_pallas_bytes: int = 256 * 1024,
            donate_x: bool = False) -> jnp.ndarray:
    """x: (B, T, D); pe_full: (max_len, D).  Returns x + pe_full[None, :T, :]."""
    B, T, D = x.shape
    TD = T * D
    itemsize = x.dtype.itemsize

    # Cast the table to the activation dtype in the wrapper so the kernel does
    # a same-dtype add (no implicit f32 promotion / narrowing store for bf16).
    pe = pe_full[:T, :].astype(x.dtype)

    total_bytes = B * TD * itemsize
    if total_bytes < min_pallas_bytes:
        # Kernel dispatch + DMA setup costs microseconds; this add costs
        # nanoseconds.  Let XLA fuse it into the consumer instead.
        return x + pe[None]

    # Free lane-dense flatten.  If T*D is not a multiple of 128 the trailing
    # block still equals the full array dim (legal); only the tail vreg stores
    # are masked.
    x2 = x.reshape(B, TD)
    pe2 = pe.reshape(1, TD)

    row_bytes = TD * itemsize
    b_blk = _choose_batch_block(B, row_bytes, _block_cap_bytes())
    n_blk = -(-B // b_blk)

    x_spec_kwargs = {}
    if n_blk >= 3:
        # Deeper input pipelining on multi-block runs: 3 in-flight input
        # buffers keep the HBM pipe full across block boundaries.
        x_spec_kwargs["pipeline_mode"] = pl.Buffered(3)

    out2 = pl.pallas_call(
        _posenc_kernel,
        out_shape=jax.ShapeDtypeStruct((B, TD), x.dtype),
        grid_spec=pltpu.PrefetchScalarGridSpec(
            num_scalar_prefetch=0,
            grid=(n_blk,),
            in_specs=[
                pl.BlockSpec((b_blk, TD), lambda i: (i, 0), **x_spec_kwargs),
                pl.BlockSpec((1, TD), lambda i: (0, 0)),      # resident PE row
            ],
            out_specs=pl.BlockSpec((b_blk, TD), lambda i: (i, 0)),
        ),
        compiler_params=pltpu.CompilerParams(
            # Shard batch blocks across TensorCores when there is more than one.
            dimension_semantics=("arbitrary",) if n_blk == 1 else ("parallel",),
        ),
        cost_estimate=pl.CostEstimate(
            flops=B * TD,
            transcendentals=0,
            bytes_accessed=2 * B * TD * itemsize + TD * itemsize,
        ),
        # Optional in-place update when the caller donates x (avoids the extra
        # HBM output allocation); off by default so non-donated calls do not
        # pick up a defensive copy.
        input_output_aliases=({0: 0} if donate_x else {}),
    )(x2, pe2)

    return out2.reshape(B, T, D)


if __name__ == "__main__":
    MAX_LEN = 5000
    T, D = 8, 32
    pe_full = _make_pe_table(MAX_LEN, D)

    key = jax.random.PRNGKey(0)
    k_small, k_med = jax.random.split(key)

    # 1) Module-scale demo shape (B=2, T=8, D=32).  Force the Pallas path so
    #    the kernel itself is exercised (default policy would use plain XLA).
    B = 2
    x_small = jax.random.normal(k_small, (B, T, D), dtype=jnp.float32)
    out_small = jax.block_until_ready(pos_enc(x_small, pe_full, min_pallas_bytes=0))
    ref_small = x_small + pe_full[None, :T, :]
    assert out_small.shape == (B, T, D)
    assert jnp.allclose(out_small, ref_small, atol=1e-6), "small-shape mismatch"

    # 2) Medium shape with a batch that is not a multiple of 8: exercises the
    #    multi-block pipelined path (4 parallel grid steps, Buffered(3) inputs)
    #    and the masked ragged last output block.
    B2 = 1000
    x_med = jax.random.normal(k_med, (B2, T, D), dtype=jnp.float32)
    out_med = jax.block_until_ready(pos_enc(x_med, pe_full))
    ref_med = x_med + pe_full[None, :T, :]
    assert out_med.shape == (B2, T, D)
    assert jnp.allclose(out_med, ref_med, atol=1e-6), "medium-shape mismatch"

    print("KERNEL_OK")
</pallas_src>

<mosaic_0001>
module attributes {stable_mosaic.version = 11 : i64} {
  func.func @_posenc_kernel(%arg0: i32, %arg1: memref<2x256xf32, #tpu.memory_space<vmem>>, %arg2: memref<1x256xf32, #tpu.memory_space<vmem>>, %arg3: memref<2x256xf32, #tpu.memory_space<vmem>>) attributes {dimension_semantics = [#tpu.dimension_semantics<arbitrary>], iteration_bounds = array<i64: 1>, scalar_prefetch = 0 : i64, scratch_operands = 0 : i64, tpu.core_type = #tpu.core_type<tc>, window_params = [{transform_indices = @transform_0, window_bounds = array<i64: 2, 256>}, {pipeline_mode = #tpu.pipeline_mode<synchronous>, transform_indices = @transform_1, window_bounds = array<i64: 1, 256>}, {transform_indices = @transform_2, window_bounds = array<i64: 2, 256>}]} {
    %c0 = arith.constant 0 : index
    %c0_0 = arith.constant 0 : index
    %0 = vector.load %arg1[%c0, %c0_0] : memref<2x256xf32, #tpu.memory_space<vmem>>, vector<2x256xf32>
    %c0_1 = arith.constant 0 : index
    %c0_2 = arith.constant 0 : index
    %1 = vector.load %arg2[%c0_1, %c0_2] : memref<1x256xf32, #tpu.memory_space<vmem>>, vector<1x256xf32>
    %2 = vector.broadcast %1 : vector<1x256xf32> to vector<2x256xf32>
    %3 = arith.addf %0, %2 : vector<2x256xf32>
    %c0_3 = arith.constant 0 : index
    %c0_4 = arith.constant 0 : index
    %4 = vector.load %arg3[%c0_3, %c0_4] : memref<2x256xf32, #tpu.memory_space<vmem>>, vector<2x256xf32>
    tpu.vector_store %arg3[%c0_3, %c0_4], %3 {strides = array<i32>} : memref<2x256xf32, #tpu.memory_space<vmem>>, vector<2x256xf32>,
    return
  }
  func.func @transform_0(%arg0: i32) -> (i32, i32) {
    %c0_i32 = arith.constant 0 : i32
    %c0_i32_0 = arith.constant 0 : i32
    return %arg0, %c0_i32 : i32, i32
  }
  func.func @transform_1(%arg0: i32) -> (i32, i32) {
    %c0_i32 = arith.constant 0 : i32
    %c0_i32_0 = arith.constant 0 : i32
    %c0_i32_1 = arith.constant 0 : i32
    return %c0_i32, %c0_i32_0 : i32, i32
  }
  func.func @transform_2(%arg0: i32) -> (i32, i32) {
    %c0_i32 = arith.constant 0 : i32
    %c0_i32_0 = arith.constant 0 : i32
    return %arg0, %c0_i32 : i32, i32
  }
}

</mosaic_0001>

<bundles_post_ra>
// kernel: tpu_custom_call.1
= control target key start
LH: loop header
LB: loop body
LE: loop exit
PB: predicated region body
PF: predicated region fallthrough
CT: control target
= control target key end

     0   :  { %7 = vsyncpa [#allocation3], 0  ;;  %s157_s0 = inlined_call_operand.hbm [shape: f32[2,256], index: 0, kind: input, shape index: {}]   ;;  %s158_s1 = inlined_call_operand.vmem [shape: f32[1,256], index: 1, kind: input, shape index: {}]   ;;  %s159_s2 = inlined_call_operand.hbm [shape: f32[2,256], index: 2, kind: output, shape index: {}]  }
   0x1   :  { %8 = vsyncpa [#allocation4], 0  ;;  %s112_s9 = smov [#allocation2]   ;;  %s64_s13 = scalar_lea.hbm %s157_s0, 64 }
   0x2   :  { %s15_s10 = sshll.u32 %s112_s9, 4  ;;  %p65_p0 = scmp.ne.s32.totalorder %s157_s0, %s64_s13  ;;  %s16_s10 = int_to_ptr.vmem [resolvable:$true] %s15_s10 }
   0x3   :  { %p68_p1 = scmp.lt.u32.totalorder %s64_s13, %s157_s0 }
   0x5   :  { %p70_p2 = pnand %p68_p1, %p65_p0 }
   0x7   :  { %73 = shalt.err (!%p70_p2)
}
   0x8   :  { %s74_s18 = scalar_lea.vmem %s16_s10, 64  ;;  %p79_p4 = scmp.lt.s32.totalorder %s16_s10, %s16_s10 }
   0x9   :  { %p75_p3 = scmp.ne.s32.totalorder %s16_s10, %s74_s18  ;;  %p80_p5 = scmp.lt.s32.totalorder %s74_s18, %s74_s18 }
   0xb   :  { %p81_p6 = por %p80_p5, %p79_p4 }
   0xd   :  { %p82_p7 = pnand %p81_p6, %p75_p3 }
   0xf   :  { %85 = shalt.err (!%p82_p7)
}
  0x10   :  { %18 = dma.hbm_to_vmem [thread:$0]  %s157_s0, 64, %s16_s10, [#allocation3]  }
  0x11   :  { %108 = dma.done.wait [#allocation3], 64  }
  0x12   :  { %109 = vsyncadd [#allocation3], 4294967232  ;;  %v27_v0 = vlaneseq  ;;  %v113_v1 = vmov 1983009808   ;;  %v25_v7 = vld [vmem:[%s158_s1] sm:$0x3] }
  0x13   :  { %v37_v2 = vunpack.c.l.s4 %v113_v1  ;;  %v24_v12 = vld [vmem:[#allocation2] sm:$0xf]  ;;  %s114_s23 = smov [#allocation5]  }
  0x14   :  { %v28_v3 = vshrl.u32 %v27_v0, 7  ;;  %s52_s0 = sshll.u32 %s114_s23, 4  ;;  %s53_s0 = int_to_ptr.vmem [resolvable:$true] %s52_s0 }
  0x15   :  { %v38_v6 = vunpack.c.0.s8 %v37_v2  ;;  %s86_s24 = scalar_lea.vmem %s53_s0, 64  ;;  %p91_p9 = scmp.lt.s32.totalorder %s53_s0, %s53_s0 }
  0x16   :  { %v29_v4 = vsub.s32 0, %v28_v3  ;;  %v33_v5 = vsub.s32 1, %v28_v3  ;;  %p87_p8 = scmp.ne.s32.totalorder %s53_s0, %s86_s24  ;;  %p92_p10 = scmp.lt.s32.totalorder %s86_s24, %s86_s24 }
  0x17   :  { %v41_v10 = vsub.s32 %v38_v6, %v28_v3 }
  0x18   :  { %v30_v8 = vrot.slane %v25_v7, %v29_v4  ;;  %v34_v9 = vrot.slane %v25_v7, %v33_v5  ;;  %p93_p11 = por %p92_p10, %p91_p9 }
  0x1a   :  { %v35_v11 = vcombine.low %v30_v8, %v34_v9  ;;  %p94_p12 = pnand %p93_p11, %p87_p8 }
  0x1c   :  { %v42_v13 = vrot.slane %v35_v11, %v41_v10 }
  0x1e   :  { %v44_v14 = vadd.f32 %v42_v13, %v24_v12 }
  0x20   :  { %45 = vst [vmem:[#allocation5] sm:$0xf] %v44_v14 }
  0x21   :  { %97 = shalt.err (!%p94_p12)
}
  0x22   :  { %s98_s26 = scalar_lea.hbm %s159_s2, 64 }
  0x23   :  { %p99_p13 = scmp.ne.s32.totalorder %s159_s2, %s98_s26  ;;  %p102_p0 = scmp.lt.u32.totalorder %s98_s26, %s159_s2 }
  0x25   :  { %p104_p1 = pnand %p102_p0, %p99_p13 }
  0x27   :  { %107 = shalt.err (!%p104_p1)
}
  0x28   :  { %55 = dma.vmem_to_hbm [thread:$0]  %s53_s0, 64, %s159_s2, [#allocation4]  }
  0x29   :  { %110 = dma.done.wait [#allocation4], 64  }
  0x2a   :  { %111 = vsyncadd [#allocation4], 4294967232 }
  0x2b   :  { %59 = vsyncpa [#allocation3], 1 }
  0x2c   :  { %60 = vsyncpa [#allocation4], 1 }

</bundles_post_ra>
